<compile_context>
chip_gen: v6e
topology: v6e:2x2x1
jax: 0.10.0
libtpu: 0.0.40
codegen_flags: <defaults>
</compile_context>

<pallas_src>
import functools

import jax
import jax.numpy as jnp
import numpy as np
from jax.experimental import pallas as pl
from jax.experimental.pallas import tpu as pltpu

_EPS = 1e-5  # nn.BatchNorm2d default eps


# --------------------------------------------------------------------------- #
# Kernel 1: conv-as-matmul over M tiles + global BN statistics accumulation.  #
# --------------------------------------------------------------------------- #
def _conv_stats_kernel(xcol_ref, w_ref, gamma_ref, beta_ref, y_ref, stats_ref,
                       *, inv_m, eps):
    # xcol_ref: [TM, K] bf16   (im2col rows for this tile)
    # w_ref:    [K, C]  bf16
    # gamma/beta: [1, C] f32
    # y_ref:    [TM, C] f32    (conv output tile, consumed by kernel 2)
    # stats_ref:[2, C]  f32    (grid-resident accumulator; finalized to scale/shift)
    i = pl.program_id(0)

    @pl.when(i == 0)
    def _init():
        stats_ref[...] = jnp.zeros_like(stats_ref)

    # MXU matmul, f32 accumulation.
    y = jnp.dot(xcol_ref[...], w_ref[...], preferred_element_type=jnp.float32)
    y_ref[...] = y

    # Per-channel partial sums for this tile (padded rows are zero -> contribute 0).
    tile_sum = jnp.sum(y, axis=0, keepdims=True)        # [1, C]
    tile_sqsum = jnp.sum(y * y, axis=0, keepdims=True)  # [1, C]
    stats_ref[...] += jnp.concatenate([tile_sum, tile_sqsum], axis=0)

    @pl.when(i == pl.num_programs(0) - 1)
    def _finalize():
        acc = stats_ref[...]                 # [2, C]: row0 = sum(y), row1 = sum(y*y)
        mean = acc[0:1, :] * inv_m
        var = acc[1:2, :] * inv_m - mean * mean          # biased batch variance
        inv_std = jax.lax.rsqrt(var + eps)
        scale = gamma_ref[...] * inv_std                 # [1, C]
        shift = beta_ref[...] - mean * scale             # [1, C]
        stats_ref[...] = jnp.concatenate([scale, shift], axis=0)


# --------------------------------------------------------------------------- #
# Kernel 2: normalize + affine + ReLU, data-parallel over M tiles.            #
# --------------------------------------------------------------------------- #
def _norm_relu_kernel(y_ref, stats_ref, o_ref):
    st = stats_ref[...]                    # [2, C]
    scale = st[0:1, :]
    shift = st[1:2, :]
    o_ref[...] = jnp.maximum(y_ref[...] * scale + shift, 0.0)


def _pick_tile_m(M, K, C):
    """M-tile size: lane/sublane aligned, ~<= 6 MB per live buffer (v7x-safe)."""
    bytes_per_row = 2 * K + 4 * C          # bf16 xcol row in + f32 y row out
    tm = (6 * 1024 * 1024) // bytes_per_row
    tm = max(8, min(2048, tm))
    tm = (tm // 8) * 8
    m_ceil = ((M + 7) // 8) * 8
    return min(tm, m_ceil)


def downsample(x, weight, gamma, beta):
    """x: [B, d, H, W] (NCHW). weight: [2d, d, 3, 3]. Returns [B, 2d, H//2, W//2]."""
    B, d, H, W = x.shape
    C = 2 * d
    OH, OW = H // 2, W // 2
    M, K = B * OH * OW, d * 9

    # ---- glue: im2col (padding=1, stride=2, kernel=3), emitted in bf16 ----
    xb = x.astype(jnp.bfloat16)
    xp = jnp.pad(xb, ((0, 0), (0, 0), (1, 1), (1, 1)))
    patches = []
    for kh in range(3):
        for kw in range(3):
            patches.append(
                jax.lax.slice(
                    xp,
                    start_indices=(0, 0, kh, kw),
                    limit_indices=(B, d, kh + 2 * (OH - 1) + 1, kw + 2 * (OW - 1) + 1),
                    strides=(1, 1, 2, 2),
                )
            )  # each [B, d, OH, OW]
    pat = jnp.stack(patches, axis=2)                     # [B, d, 9, OH, OW], 9 = kh*3+kw
    xcol = pat.transpose(0, 3, 4, 1, 2).reshape(M, K)    # bf16, K index = ic*9+kh*3+kw
    wmat = weight.reshape(C, K).T.astype(jnp.bfloat16)   # [K, C], same K ordering

    # ---- M tiling (pad rows with zeros; zero rows contribute 0 to the BN sums) ----
    TM = _pick_tile_m(M, K, C)
    M_pad = ((M + TM - 1) // TM) * TM
    if M_pad != M:
        xcol = jnp.pad(xcol, ((0, M_pad - M), (0, 0)))
    n_tiles = M_pad // TM

    gamma2 = gamma.reshape(1, C).astype(jnp.float32)
    beta2 = beta.reshape(1, C).astype(jnp.float32)

    vmem_limit = 32 * 1024 * 1024  # explicit; working set stays well below (v7x-safe)

    # ---- phase 1: conv matmul + global BN statistics (reduction axis: arbitrary) ----
    y_flat, stats = pl.pallas_call(
        functools.partial(_conv_stats_kernel, inv_m=1.0 / M, eps=_EPS),
        out_shape=(
            jax.ShapeDtypeStruct((M_pad, C), jnp.float32),   # conv output y
            jax.ShapeDtypeStruct((2, C), jnp.float32),       # per-channel scale/shift
        ),
        grid=(n_tiles,),
        in_specs=[
            pl.BlockSpec((TM, K), lambda i: (i, 0)),
            pl.BlockSpec((K, C), lambda i: (0, 0)),
            pl.BlockSpec((1, C), lambda i: (0, 0)),
            pl.BlockSpec((1, C), lambda i: (0, 0)),
        ],
        out_specs=(
            pl.BlockSpec((TM, C), lambda i: (i, 0)),
            pl.BlockSpec((2, C), lambda i: (0, 0)),          # resident accumulator
        ),
        compiler_params=pltpu.CompilerParams(
            dimension_semantics=("arbitrary",),
            vmem_limit_bytes=vmem_limit,
        ),
    )(xcol, wmat, gamma2, beta2)

    # ---- phase 2: normalize + affine + ReLU (parallel -> megacore on v7x) ----
    out_flat = pl.pallas_call(
        _norm_relu_kernel,
        out_shape=jax.ShapeDtypeStruct((M_pad, C), jnp.float32),
        grid=(n_tiles,),
        in_specs=[
            pl.BlockSpec((TM, C), lambda i: (i, 0)),
            pl.BlockSpec((2, C), lambda i: (0, 0)),
        ],
        out_specs=pl.BlockSpec((TM, C), lambda i: (i, 0)),
        compiler_params=pltpu.CompilerParams(
            dimension_semantics=("parallel",),
            vmem_limit_bytes=vmem_limit,
        ),
    )(y_flat, stats)

    # ---- glue: drop row padding, back to NCHW (kept to match the module contract;
    #      an NHWC consumer could skip this transpose entirely) ----
    out_flat = out_flat[:M]
    return out_flat.reshape(B, OH, OW, C).transpose(0, 3, 1, 2)


def _reference(x, weight, gamma, beta):
    """Pure-JAX reference mirroring Conv2d(bf16 operands, f32 accum) + BN(train) + ReLU."""
    y = jax.lax.conv_general_dilated(
        x.astype(jnp.bfloat16), weight.astype(jnp.bfloat16),
        window_strides=(2, 2), padding=((1, 1), (1, 1)),
        dimension_numbers=("NCHW", "OIHW", "NCHW"),
        preferred_element_type=jnp.float32,
    )
    mean = jnp.mean(y, axis=(0, 2, 3), keepdims=True)
    var = jnp.mean((y - mean) ** 2, axis=(0, 2, 3), keepdims=True)
    y = (y - mean) * jax.lax.rsqrt(var + _EPS)
    y = y * gamma.reshape(1, -1, 1, 1) + beta.reshape(1, -1, 1, 1)
    return jnp.maximum(y, 0.0)


if __name__ == "__main__":
    B, d, H, W = 2, 4, 16, 16
    key = jax.random.PRNGKey(0)
    kx, kw = jax.random.split(key)

    x = jax.random.normal(kx, (B, d, H, W), dtype=jnp.float32)
    fan_in = d * 9
    weight = jax.random.normal(kw, (2 * d, d, 3, 3), dtype=jnp.float32) / np.sqrt(fan_in)
    gamma = jnp.ones((2 * d,), dtype=jnp.float32)   # BatchNorm2d init: gamma=1
    beta = jnp.zeros((2 * d,), dtype=jnp.float32)   # beta=0

    out = downsample(x, weight, gamma, beta)
    jax.block_until_ready(out)

    ref = _reference(x, weight, gamma, beta)
    assert out.shape == (B, 2 * d, H // 2, W // 2), out.shape
    np.testing.assert_allclose(np.asarray(out), np.asarray(ref), atol=2e-3, rtol=2e-3)

    print("KERNEL_OK")
</pallas_src>

<mosaic_0001>
module attributes {stable_mosaic.version = 11 : i64} {
  func.func @_conv_stats_kernel(%arg0: i32, %arg1: memref<128x36xbf16, #tpu.memory_space<vmem>>, %arg2: memref<36x8xbf16, #tpu.memory_space<vmem>>, %arg3: memref<1x8xf32, #tpu.memory_space<vmem>>, %arg4: memref<1x8xf32, #tpu.memory_space<vmem>>, %arg5: memref<128x8xf32, #tpu.memory_space<vmem>>, %arg6: memref<2x8xf32, #tpu.memory_space<vmem>>) attributes {dimension_semantics = [#tpu.dimension_semantics<arbitrary>], iteration_bounds = array<i64: 1>, scalar_prefetch = 0 : i64, scratch_operands = 0 : i64, tpu.core_type = #tpu.core_type<tc>, window_params = [{transform_indices = @transform_0, window_bounds = array<i64: 128, 36>}, {pipeline_mode = #tpu.pipeline_mode<synchronous>, transform_indices = @transform_1, window_bounds = array<i64: 36, 8>}, {pipeline_mode = #tpu.pipeline_mode<synchronous>, transform_indices = @transform_2, window_bounds = array<i64: 1, 8>}, {pipeline_mode = #tpu.pipeline_mode<synchronous>, transform_indices = @transform_3, window_bounds = array<i64: 1, 8>}, {transform_indices = @transform_4, window_bounds = array<i64: 128, 8>}, {pipeline_mode = #tpu.pipeline_mode<synchronous>, transform_indices = @transform_5, window_bounds = array<i64: 2, 8>}]} {
    %c0_i32 = arith.constant 0 : i32
    %0 = arith.cmpi eq, %arg0, %c0_i32 : i32
    %1 = arith.extui %0 : i1 to i32
    %c0_i32_0 = arith.constant 0 : i32
    %2 = arith.cmpi ne, %1, %c0_i32_0 : i32
    scf.if %2 {
      %cst_14 = arith.constant 0.000000e+00 : f32
      %19 = vector.broadcast %cst_14 : f32 to vector<2x8xf32>
      %c0_15 = arith.constant 0 : index
      %c0_16 = arith.constant 0 : index
      %20 = vector.load %arg6[%c0_15, %c0_16] : memref<2x8xf32, #tpu.memory_space<vmem>>, vector<2x8xf32>
      tpu.vector_store %arg6[%c0_15, %c0_16], %19 {strides = array<i32>} : memref<2x8xf32, #tpu.memory_space<vmem>>, vector<2x8xf32>,
    } else {
    }
    %c0 = arith.constant 0 : index
    %c0_1 = arith.constant 0 : index
    %3 = vector.load %arg1[%c0, %c0_1] : memref<128x36xbf16, #tpu.memory_space<vmem>>, vector<128x36xbf16>
    %c0_2 = arith.constant 0 : index
    %c0_3 = arith.constant 0 : index
    %4 = vector.load %arg2[%c0_2, %c0_3] : memref<36x8xbf16, #tpu.memory_space<vmem>>, vector<36x8xbf16>
    %cst = arith.constant dense<0.000000e+00> : vector<128x8xf32>
    %5 = tpu.matmul %3, %4, %cst {dimension_numbers = #tpu.dot_dimension_numbers<[1], [0], [0], [1], [0, 0, 1, 1], [], []>} : vector<128x36xbf16>, vector<36x8xbf16>, vector<128x8xf32> -> vector<128x8xf32>
    %c0_4 = arith.constant 0 : index
    %c0_5 = arith.constant 0 : index
    %6 = vector.load %arg5[%c0_4, %c0_5] : memref<128x8xf32, #tpu.memory_space<vmem>>, vector<128x8xf32>
    tpu.vector_store %arg5[%c0_4, %c0_5], %5 {strides = array<i32>} : memref<128x8xf32, #tpu.memory_space<vmem>>, vector<128x8xf32>,
    %cst_6 = arith.constant dense<0.000000e+00> : vector<8xf32>
    %7 = vector.multi_reduction <add>, %5, %cst_6 [0] : vector<128x8xf32> to vector<8xf32>
    %8 = vector.shape_cast %7 : vector<8xf32> to vector<1x8xf32>
    %9 = arith.mulf %5, %5 : vector<128x8xf32>
    %cst_7 = arith.constant dense<0.000000e+00> : vector<8xf32>
    %10 = vector.multi_reduction <add>, %9, %cst_7 [0] : vector<128x8xf32> to vector<8xf32>
    %11 = vector.shape_cast %10 : vector<8xf32> to vector<1x8xf32>
    %c0_8 = arith.constant 0 : index
    %c0_9 = arith.constant 0 : index
    %12 = vector.load %arg6[%c0_8, %c0_9] : memref<2x8xf32, #tpu.memory_space<vmem>>, vector<2x8xf32>
    %13 = tpu.concatenate %8, %11 in 0 : vector<1x8xf32>, vector<1x8xf32> -> vector<2x8xf32>
    %14 = arith.addf %12, %13 : vector<2x8xf32>
    %c0_10 = arith.constant 0 : index
    %c0_11 = arith.constant 0 : index
    %15 = vector.load %arg6[%c0_10, %c0_11] : memref<2x8xf32, #tpu.memory_space<vmem>>, vector<2x8xf32>
    tpu.vector_store %arg6[%c0_10, %c0_11], %14 {strides = array<i32>} : memref<2x8xf32, #tpu.memory_space<vmem>>, vector<2x8xf32>,
    %c0_i32_12 = arith.constant 0 : i32
    %16 = arith.cmpi eq, %arg0, %c0_i32_12 : i32
    %17 = arith.extui %16 : i1 to i32
    %c0_i32_13 = arith.constant 0 : i32
    %18 = arith.cmpi ne, %17, %c0_i32_13 : i32
    scf.if %18 {
      %c0_14 = arith.constant 0 : index
      %c0_15 = arith.constant 0 : index
      %19 = vector.load %arg6[%c0_14, %c0_15] : memref<2x8xf32, #tpu.memory_space<vmem>>, vector<2x8xf32>
      %20 = vector.extract_strided_slice %19 {offsets = [0, 0], sizes = [1, 8], strides = [1, 1]} : vector<2x8xf32> to vector<1x8xf32>
      %cst_16 = arith.constant 7.812500e-03 : f32
      %21 = vector.broadcast %cst_16 : f32 to vector<1x8xf32>
      %22 = arith.mulf %20, %21 : vector<1x8xf32>
      %23 = vector.extract_strided_slice %19 {offsets = [1, 0], sizes = [1, 8], strides = [1, 1]} : vector<2x8xf32> to vector<1x8xf32>
      %cst_17 = arith.constant 7.812500e-03 : f32
      %24 = vector.broadcast %cst_17 : f32 to vector<1x8xf32>
      %25 = arith.mulf %23, %24 : vector<1x8xf32>
      %26 = arith.mulf %22, %22 : vector<1x8xf32>
      %27 = arith.subf %25, %26 : vector<1x8xf32>
      %cst_18 = arith.constant 9.99999974E-6 : f32
      %28 = vector.broadcast %cst_18 : f32 to vector<1x8xf32>
      %29 = arith.addf %27, %28 : vector<1x8xf32>
      %30 = math.rsqrt %29 : vector<1x8xf32>
      %c0_19 = arith.constant 0 : index
      %c0_20 = arith.constant 0 : index
      %31 = vector.load %arg3[%c0_19, %c0_20] : memref<1x8xf32, #tpu.memory_space<vmem>>, vector<1x8xf32>
      %32 = arith.mulf %31, %30 : vector<1x8xf32>
      %c0_21 = arith.constant 0 : index
      %c0_22 = arith.constant 0 : index
      %33 = vector.load %arg4[%c0_21, %c0_22] : memref<1x8xf32, #tpu.memory_space<vmem>>, vector<1x8xf32>
      %34 = arith.mulf %22, %32 : vector<1x8xf32>
      %35 = arith.subf %33, %34 : vector<1x8xf32>
      %36 = tpu.concatenate %32, %35 in 0 : vector<1x8xf32>, vector<1x8xf32> -> vector<2x8xf32>
      %c0_23 = arith.constant 0 : index
      %c0_24 = arith.constant 0 : index
      %37 = vector.load %arg6[%c0_23, %c0_24] : memref<2x8xf32, #tpu.memory_space<vmem>>, vector<2x8xf32>
      tpu.vector_store %arg6[%c0_23, %c0_24], %36 {strides = array<i32>} : memref<2x8xf32, #tpu.memory_space<vmem>>, vector<2x8xf32>,
    } else {
    }
    return
  }
  func.func @transform_0(%arg0: i32) -> (i32, i32) {
    %c0_i32 = arith.constant 0 : i32
    %c0_i32_0 = arith.constant 0 : i32
    return %arg0, %c0_i32 : i32, i32
  }
  func.func @transform_1(%arg0: i32) -> (i32, i32) {
    %c0_i32 = arith.constant 0 : i32
    %c0_i32_0 = arith.constant 0 : i32
    %c0_i32_1 = arith.constant 0 : i32
    return %c0_i32, %c0_i32_0 : i32, i32
  }
  func.func @transform_2(%arg0: i32) -> (i32, i32) {
    %c0_i32 = arith.constant 0 : i32
    %c0_i32_0 = arith.constant 0 : i32
    %c0_i32_1 = arith.constant 0 : i32
    return %c0_i32, %c0_i32_0 : i32, i32
  }
  func.func @transform_3(%arg0: i32) -> (i32, i32) {
    %c0_i32 = arith.constant 0 : i32
    %c0_i32_0 = arith.constant 0 : i32
    %c0_i32_1 = arith.constant 0 : i32
    return %c0_i32, %c0_i32_0 : i32, i32
  }
  func.func @transform_4(%arg0: i32) -> (i32, i32) {
    %c0_i32 = arith.constant 0 : i32
    %c0_i32_0 = arith.constant 0 : i32
    return %arg0, %c0_i32 : i32, i32
  }
  func.func @transform_5(%arg0: i32) -> (i32, i32) {
    %c0_i32 = arith.constant 0 : i32
    %c0_i32_0 = arith.constant 0 : i32
    %c0_i32_1 = arith.constant 0 : i32
    return %c0_i32, %c0_i32_0 : i32, i32
  }
}

</mosaic_0001>

<bundles_post_ra>
// kernel: tpu_custom_call.1
= control target key start
LH: loop header
LB: loop body
LE: loop exit
PB: predicated region body
PF: predicated region fallthrough
CT: control target
= control target key end

     0   :  { %vm128_vm0 = vcmask 1041408   ;;  %vm103_vm1 = vcmask 293888   ;;  %s714_s0 = inlined_call_operand.vmem [shape: bf16[128,36], index: 0, kind: input, shape index: {}]   ;;  %s715_s1 = inlined_call_operand.vmem [shape: bf16[36,8], index: 1, kind: input, shape index: {}]   ;;  %s716_s2 = inlined_call_operand.vmem [shape: f32[1,8], index: 2, kind: input, shape index: {}]   ;;  %s717_s3 = inlined_call_operand.vmem [shape: f32[1,8], index: 3, kind: input, shape index: {}]   ;;  %s718_s4 = inlined_call_operand.vmem [shape: f32[128,8], index: 4, kind: output, shape index: {0}]   ;;  %s719_s5 = inlined_call_operand.hbm [shape: f32[2,8], index: 5, kind: output, shape index: {1}]  }
   0x1   :  { %v465_v0 = vld [vmem:[%s715_s1 + $0x10] ss:$0 sps:$4 sm:$0x33]   ;;  %v466_v1 = vld [vmem:[%s715_s1 + $0x8] sm:$0xff]   ;;  %v468_v3 = vld [vmem:[%s714_s0] sm:$0xff]  }
   0x2   :  { %460 = vmatprep.subr.msk.bf16.mxu0 %vm128_vm0, %v465_v0  ;;  %v130_v2 = vsel %vm128_vm0, %v465_v0, 0  ;;  %461 = vmatprep.subr.msk.bf16.mxu1 %vm128_vm0, %v465_v0  ;;  %v467_v4 = vld [vmem:[%s715_s1] sm:$0xff]   ;;  %v469_v6 = vld [vmem:[%s714_s0 + $0x8] sm:$0xff]   ;;  %v470_v8 = vld [vmem:[%s714_s0 + $0x10] sm:$0xff]  }
   0x3   :  { %433 = vmatpush3.bf16.msra.mxu0 %v130_v2  ;;  %457 = vmatpush3.bf16.msra.mxu1 %v130_v2  ;;  %v472_v5 = vld [vmem:[%s714_s0 + $0x20] sm:$0xff]   ;;  %v473_v7 = vld [vmem:[%s714_s0 + $0x28] sm:$0xff]   ;;  %v474_v9 = vld [vmem:[%s714_s0 + $0x30] sm:$0xff]  }
   0x4   :  { %434 = vmatprep.subr.bf16.mxu0 %v466_v1  ;;  %455 = vmatprep.subr.bf16.mxu1 %v466_v1 }
   0x5   :  { %438 = vmatprep.mubr.msk.bf16.mxu0 %vm103_vm1, %v468_v3  ;;  %446 = vmatprep.mubr.msk.bf16.mxu1 %vm103_vm1, %v472_v5 }
   0x7   :  { %435 = vmatpush3.bf16.msra.mxu0 %v466_v1  ;;  %458 = vmatpush3.bf16.msra.mxu1 %v466_v1 }
   0x8   :  { %436 = vmatprep.subr.bf16.mxu0 %v467_v4  ;;  %456 = vmatprep.subr.bf16.mxu1 %v467_v4 }
   0xb   :  { %437 = vmatpush3.bf16.msra.mxu0 %v467_v4  ;;  %459 = vmatpush3.bf16.msra.mxu1 %v467_v4 }
   0xc   :  { %11 = vsyncpa [#allocation3], 0  ;;  %v471_v10 = vld [vmem:[%s714_s0 + $0x18] sm:$0xff]   ;;  %vm25_vm2 = vcmask 58368   ;;  %v500_v12 = vmov 0.0   ;;  %vm229_vm3 = vcmask 64512  }
   0xd   :  { %v475_v11 = vld [vmem:[%s714_s0 + $0x38] sm:$0xff]   ;;  %26 = vst.msk [vmem:[#allocation2] sm:$0x3] %vm25_vm2, %v500_v12  ;;  %vm337_vm4 = vcmask 1040384   ;;  %s502_s21 = smov [#allocation2]  }
   0xe   :  { %439 = vmatmul.mubr.msk.bf16.vlgmr.msra.gmra.mxu0 %vm103_vm1, %v469_v6  ;;  %447 = vmatmul.mubr.msk.bf16.vlgmr.msra.gmra.mxu1 %vm103_vm1, %v473_v7  ;;  %s392_s22 = sshll.u32 %s502_s21, 4  ;;  %s393_s22 = int_to_ptr.vmem [resolvable:$true] %s392_s22 }
   0xf   :  { %442 = vmatprep.mubr.msk.bf16.mxu0 %vm103_vm1, %v470_v8  ;;  %450 = vmatprep.mubr.msk.bf16.mxu1 %vm103_vm1, %v474_v9  ;;  %s478_s23 = scalar_lea.vmem %s393_s22, 32  ;;  %p483_p1 = scmp.lt.s32.totalorder %s393_s22, %s393_s22 }
  0x10   :  { %p479_p0 = scmp.ne.s32.totalorder %s393_s22, %s478_s23  ;;  %p484_p2 = scmp.lt.s32.totalorder %s478_s23, %s478_s23 }
  0x12   :  { %p485_p3 = por %p484_p2, %p483_p1 }
  0x14   :  { %p486_p4 = pnand %p485_p3, %p479_p0 }
  0x16   :  { %443 = vmatmul.mubr.msk.bf16.gmra.mxu0 %vm103_vm1, %v471_v10  ;;  %451 = vmatmul.mubr.msk.bf16.gmra.mxu1 %vm103_vm1, %v475_v11 }
  0xce   :  { %v440_v13 = vpop.f32.mrf.mxu0  ;;  %v575_v14 = vpop.f32.mrf.mxu1 }
  0xcf   :  { %232 = vst.msk [vmem:[%s718_s4 + $0x10] sm:$0xff] %vm229_vm3, %v440_v13  ;;  %240 = vst.msk [vmem:[%s718_s4 + $0x50] sm:$0xff] %vm229_vm3, %v575_v14  ;;  %v285_v22 = vmul.f32 %v440_v13, %v440_v13  ;;  %v249_v29 = vsel %vm229_vm3, %v440_v13, 0.0  ;;  %v293_v7 = vmul.f32 %v575_v14, %v575_v14  ;;  %v265_v12 = vsel %vm229_vm3, %v575_v14, 0.0 }
  0xd0   :  { %v166_v15 = vpop.f32.mrf.mxu0  ;;  %v586_v16 = vpop.f32.mrf.mxu1 }
  0xd1   :  { %230 = vst.msk [vmem:[%s718_s4] sm:$0xff] %vm229_vm3, %v166_v15  ;;  %238 = vst.msk [vmem:[%s718_s4 + $0x40] sm:$0xff] %vm229_vm3, %v586_v16  ;;  %v283_v19 = vmul.f32 %v166_v15, %v166_v15  ;;  %v246_v23 = vsel %vm229_vm3, %v166_v15, 0.0  ;;  %v302_v37 = vsel %vm229_vm3, %v285_v22, 0.0  ;;  %v291_v63 = vmul.f32 %v586_v16, %v586_v16 }
  0xd2   :  { %v441_v17 = vpop.f32.mrf.mxu0  ;;  %v597_v18 = vpop.f32.mrf.mxu1  ;;  %v261_v3 = vsel %vm229_vm3, %v586_v16, 0.0 }
  0xd3   :  { %233 = vst.msk [vmem:[%s718_s4 + $0x18] sm:$0xff] %vm229_vm3, %v441_v17  ;;  %241 = vst.msk [vmem:[%s718_s4 + $0x58] sm:$0xff] %vm229_vm3, %v597_v18  ;;  %v299_v30 = vsel %vm229_vm3, %v283_v19, 0.0  ;;  %v286_v31 = vmul.f32 %v441_v17, %v441_v17  ;;  %v251_v38 = vsel %vm229_vm3, %v441_v17, 0.0  ;;  %v314_v8 = vsel %vm229_vm3, %v291_v63, 0.0 }
  0xd4   :  { %v169_v20 = vpop.f32.mrf.mxu0  ;;  %v201_v21 = vpop.f32.mrf.mxu1  ;;  %v294_v13 = vmul.f32 %v597_v18, %v597_v18  ;;  %v318_v19 = vsel %vm229_vm3, %v293_v7, 0.0 }
  0xd5   :  { %231 = vst.msk [vmem:[%s718_s4 + $0x8] sm:$0xff] %vm229_vm3, %v169_v20  ;;  %v247_v24 = vsel %vm229_vm3, %v169_v20, 0.0  ;;  %v284_v25 = vmul.f32 %v169_v20, %v169_v20  ;;  %239 = vst.msk [vmem:[%s718_s4 + $0x48] sm:$0xff] %vm229_vm3, %v201_v21  ;;  %v304_v44 = vsel %vm229_vm3, %v286_v31, 0.0  ;;  %v292_v4 = vmul.f32 %v201_v21, %v201_v21 }
  0xd6   :  { %v248_v26 = vadd.f32 %v247_v24, %v246_v23  ;;  %v444_v27 = vpop.f32.mrf.mxu0  ;;  %v618_v28 = vpop.f32.mrf.mxu1  ;;  %v263_v9 = vsel %vm229_vm3, %v201_v21, 0.0  ;;  %v267_v20 = vsel %vm229_vm3, %v597_v18, 0.0  ;;  %v320_v24 = vsel %vm229_vm3, %v294_v13, 0.0 }
  0xd7   :  { %v300_v32 = vsel %vm229_vm3, %v284_v25, 0.0  ;;  %236 = vst.msk [vmem:[%s718_s4 + $0x30] sm:$0xff] %vm229_vm3, %v444_v27  ;;  %244 = vst.msk [vmem:[%s718_s4 + $0x70] sm:$0xff] %vm229_vm3, %v618_v28  ;;  %v289_v50 = vmul.f32 %v444_v27, %v444_v27  ;;  %v257_v56 = vsel %vm229_vm3, %v444_v27, 0.0  ;;  %v316_v15 = vsel %vm229_vm3, %v292_v4, 0.0 }
  0xd8   :  { %v250_v33 = vadd.f32 %v249_v29, %v248_v26  ;;  %v301_v34 = vadd.f32 %v300_v32, %v299_v30  ;;  %v182_v35 = vpop.f32.mrf.mxu0  ;;  %v214_v36 = vpop.f32.mrf.mxu1  ;;  %v297_v29 = vmul.f32 %v618_v28, %v618_v28  ;;  %v273_v18 = vsel %vm229_vm3, %v618_v28, 0.0 }
  0xd9   :  { %234 = vst.msk [vmem:[%s718_s4 + $0x20] sm:$0xff] %vm229_vm3, %v182_v35  ;;  %v287_v39 = vmul.f32 %v182_v35, %v182_v35  ;;  %242 = vst.msk [vmem:[%s718_s4 + $0x60] sm:$0xff] %vm229_vm3, %v214_v36  ;;  %v253_v45 = vsel %vm229_vm3, %v182_v35, 0.0  ;;  %v310_v61 = vsel %vm229_vm3, %v289_v50, 0.0  ;;  %v295_v22 = vmul.f32 %v214_v36, %v214_v36 }
  0xda   :  { %v303_v40 = vadd.f32 %v302_v37, %v301_v34  ;;  %v252_v41 = vadd.f32 %v251_v38, %v250_v33  ;;  %v445_v42 = vpop.f32.mrf.mxu0  ;;  %v642_v43 = vpop.f32.mrf.mxu1  ;;  %v269_v25 = vsel %vm229_vm3, %v214_v36, 0.0  ;;  %v326_v38 = vsel %vm229_vm3, %v297_v29, 0.0 }
  0xdb   :  { %237 = vst.msk [vmem:[%s718_s4 + $0x38] sm:$0xff] %vm229_vm3, %v445_v42  ;;  %245 = vst.msk [vmem:[%s718_s4 + $0x78] sm:$0xff] %vm229_vm3, %v642_v43  ;;  %v306_v51 = vsel %vm229_vm3, %v287_v39, 0.0  ;;  %v290_v57 = vmul.f32 %v445_v42, %v445_v42  ;;  %v259_v62 = vsel %vm229_vm3, %v445_v42, 0.0  ;;  %v322_v30 = vsel %vm229_vm3, %v295_v22, 0.0 }
  0xdc   :  { %v254_v46 = vadd.f32 %v253_v45, %v252_v41  ;;  %v305_v47 = vadd.f32 %v304_v44, %v303_v40  ;;  %v185_v48 = vpop.f32.mrf.mxu0  ;;  %v217_v49 = vpop.f32.mrf.mxu1  ;;  %v298_v34 = vmul.f32 %v642_v43, %v642_v43  ;;  %v275_v39 = vsel %vm229_vm3, %v642_v43, 0.0 }
  0xdd   :  { %235 = vst.msk [vmem:[%s718_s4 + $0x28] sm:$0xff] %vm229_vm3, %v185_v48  ;;  %v255_v52 = vsel %vm229_vm3, %v185_v48, 0.0  ;;  %v288_v53 = vmul.f32 %v185_v48, %v185_v48  ;;  %243 = vst.msk [vmem:[%s718_s4 + $0x68] sm:$0xff] %vm229_vm3, %v217_v49  ;;  %v312_v2 = vsel %vm229_vm3, %v290_v57, 0.0  ;;  %v296_v14 = vmul.f32 %v217_v49, %v217_v49 }
  0xde   :  { %v307_v54 = vadd.f32 %v306_v51, %v305_v47  ;;  %v256_v55 = vadd.f32 %v255_v52, %v254_v46  ;;  %v271_v31 = vsel %vm229_vm3, %v217_v49, 0.0  ;;  %v328_v42 = vsel %vm229_vm3, %v298_v34, 0.0 }
  0xdf   :  { %v308_v58 = vsel %vm229_vm3, %v288_v53, 0.0  ;;  %v324_v35 = vsel %vm229_vm3, %v296_v14, 0.0 }
  0xe0   :  { %v258_v59 = vadd.f32 %v257_v56, %v256_v55  ;;  %v309_v60 = vadd.f32 %v308_v58, %v307_v54  ;;  %v336_v56 = vld [vmem:[#allocation2] sm:$0x3] }
  0xe2   :  { %v260_v0 = vadd.f32 %v259_v62, %v258_v59  ;;  %v311_v1 = vadd.f32 %v310_v61, %v309_v60 }
  0xe4   :  { %v313_v5 = vadd.f32 %v312_v2, %v311_v1  ;;  %v262_v6 = vadd.f32 %v261_v3, %v260_v0  ;;  %v501_v0 = vmov 1966171168   ;;  %v359_v2 = vlaneseq }
  0xe5   :  { %v357_v1 = vunpack.c.l.s4 %v501_v0 }
  0xe6   :  { %v264_v10 = vadd.f32 %v263_v9, %v262_v6  ;;  %v315_v11 = vadd.f32 %v314_v8, %v313_v5  ;;  %v360_v4 = vshrl.u32 %v359_v2, 7  ;;  %v354_v9 = vld [vmem:[%s716_s2] sm:$0x1] }
  0xe7   :  { %v358_v3 = vunpack.c.0.s8 %v357_v1 }
  0xe8   :  { %v266_v16 = vadd.f32 %v265_v12, %v264_v10  ;;  %v317_v17 = vadd.f32 %v316_v15, %v315_v11  ;;  %v373_v12 = vld [vmem:[%s717_s3] sm:$0x1]  ;;  %v379_v15 = vsub.s32 0, %v360_v4 }
  0xe9   :  { %v361_v5 = vsub.s32 %v358_v3, %v360_v4 }
  0xea   :  { %v319_v23 = vadd.f32 %v318_v19, %v317_v17  ;;  %v268_v21 = vadd.f32 %v267_v20, %v266_v16 }
  0xec   :  { %v270_v26 = vadd.f32 %v269_v25, %v268_v21  ;;  %v321_v27 = vadd.f32 %v320_v24, %v319_v23 }
  0xee   :  { %v323_v32 = vadd.f32 %v322_v30, %v321_v27  ;;  %v272_v33 = vadd.f32 %v271_v31, %v270_v26 }
  0xf0   :  { %v274_v36 = vadd.f32 %v273_v18, %v272_v33  ;;  %v325_v37 = vadd.f32 %v324_v35, %v323_v32 }
  0xf2   :  { %v276_v40 = vadd.f32 %v275_v39, %v274_v36  ;;  %v327_v41 = vadd.f32 %v326_v38, %v325_v37 }
  0xf4   :  { %v277_v44 = vrot.slane %v276_v40, 4  ;;  %v329_v45 = vadd.f32 %v328_v42, %v327_v41 }
  0xf6   :  { %v278_v46 = vadd.f32 %v277_v44, %v276_v40  ;;  %v330_v28 = vrot.slane %v329_v45, 4 }
  0xf8   :  { %v279_v47 = vrot.slane %v278_v46, 2  ;;  %v331_v48 = vadd.f32 %v330_v28, %v329_v45 }
  0xfa   :  { %v280_v49 = vadd.f32 %v279_v47, %v278_v46  ;;  %v332_v50 = vrot.slane %v331_v48, 2 }
  0xfc   :  { %v281_v51 = vrot.slane %v280_v49, 1  ;;  %v333_v52 = vadd.f32 %v332_v50, %v331_v48 }
  0xfe   :  { %v334_v53 = vrot.slane %v333_v52, 1  ;;  %v282_v54 = vadd.f32 %v281_v51, %v280_v49 }
 0x100   :  { %v335_v55 = vadd.f32 %v334_v53, %v333_v52 }
 0x102   :  { %v338_v43 = vsel %vm337_vm4, %v282_v54, %v335_v55 }
 0x103   :  { %v339_v57 = vadd.f32 %v338_v43, %v336_v56 }
 0x105   :  { %341 = vst.msk [vmem:[#allocation2] sm:$0x3] %vm25_vm2, %v339_v57 }
 0x10c   :  { %v345_v58 = vld [vmem:[#allocation2] sm:$0x3] }
 0x10d   :  { %v346_v59 = vmul.f32 0.0078125, %v345_v58 }
 0x10f   :  { %v347_v60 = vmul.f32 %v346_v59, %v346_v59 }
 0x111   :  { %v349_v61 = vrot.slane %v347_v60, 7 }
 0x113   :  { %v351_v62 = vsub.f32 %v346_v59, %v349_v61 }
 0x115   :  { %v352_v63 = vadd.f32 1e-05, %v351_v62 }
 0x117   :  { %476 = vrsqrt.f32 %v352_v63 }
 0x124   :  { %v477_v6 = vpop.eup %476 }
 0x125   :  { %v362_v7 = vrot.slane %v477_v6, %v361_v5 }
 0x127   :  { %v363_v8 = vcombine.high %v362_v7, %v362_v7 }
 0x129   :  { %v370_v10 = vrot.slane %v363_v8, %v361_v5 }
 0x12b   :  { %v372_v11 = vmul.f32 %v370_v10, %v354_v9 }
 0x12d   :  { %v374_v13 = vmul.f32 %v372_v11, %v346_v59 }
 0x12f   :  { %v375_v16 = vsub.f32 %v373_v12, %v374_v13 }
 0x131   :  { %v380_v17 = vrot.slane %v375_v16, %v379_v15 }
 0x133   :  { %v382_v19 = vsel %vm337_vm4, %v372_v11, %v380_v17 }
 0x134   :  { %383 = vst.msk [vmem:[#allocation2] sm:$0x3] %vm25_vm2, %v382_v19 }
 0x135   :  { %489 = shalt.err (!%p486_p4)
}
 0x136   :  { %395 = dma.vmem_to_hbm [thread:$0]  %s393_s22, 32, %s719_s5, [#allocation3]  }
 0x137   :  { %498 = dma.done.wait [#allocation3], 32  }
 0x138   :  { %499 = vsyncadd [#allocation3], 4294967264 }
 0x139   :  { %401 = vsyncpa [#allocation3], 1 }

</bundles_post_ra>
